<compile_context>
chip_gen: v7x
topology: tpu7x:2x2x1
jax: 0.10.0
libtpu: 0.0.40
codegen_flags: <defaults>
</compile_context>

<pallas_src>
import jax
import jax.numpy as jnp
from jax import lax
from jax.experimental import pallas as pl
from jax.experimental.pallas import tpu as pltpu


def _round_up(x, m):
    return ((x + m - 1) // m) * m


def skipgram_kernel(idx_ref, emb_hbm, w_ref, out_ref, h32, h16, sems):
    """Compute one (TB, TV) logits tile.

    idx_ref : (B_pad,) int32 in SMEM (scalar prefetch)  -- token ids
    emb_hbm : (V, E_pad) f32  in HBM (memory_space=ANY) -- Embedding.weight
    w_ref   : (TV, E_pad) bf16 in VMEM                  -- Linear.weight tile
    out_ref : (TB, TV) f32    in VMEM                   -- logits tile
    h32     : (TB, E_pad) f32  VMEM scratch             -- gathered rows
    h16     : (TB, E_pad) bf16 VMEM scratch             -- rows cast for MXU
    sems    : (TB,) DMA semaphores
    """
    TB = h32.shape[0]
    b = pl.program_id(0)          # batch-tile index (outer grid axis)
    v = pl.program_id(1)          # vocab-tile index (inner grid axis)

    # ---- batched embedding gather: once per batch tile, reused for all v ----
    @pl.when(v == 0)
    def _gather():
        base = b * TB

        @pl.loop(0, TB)
        def _start(i):
            row = idx_ref[base + i]
            pltpu.make_async_copy(
                emb_hbm.at[pl.ds(row, 1), :],
                h32.at[pl.ds(i, 1), :],
                sems.at[i],
            ).start()

        @pl.loop(0, TB)
        def _wait(i):
            pltpu.make_async_copy(
                emb_hbm.at[pl.ds(0, 1), :],     # dummy src (shape only)
                h32.at[pl.ds(i, 1), :],
                sems.at[i],
            ).wait()

        # Cast once per batch tile; every vocab step just reads bf16 rows.
        h16[...] = h32[...].astype(h16.dtype)

    # ---- hidden_to_output: h @ W^T with W kept in native (V, E) layout ----
    out_ref[...] = lax.dot_general(
        h16[...], w_ref[...],
        dimension_numbers=(((1,), (1,)), ((), ())),    # contract over E
        preferred_element_type=jnp.float32)


def skipgram_forward(indices, emb_table, linear_weight, *,
                     tb=256, tv=512, param_dtype=jnp.bfloat16):
    """SkipGram forward: logits = Embedding(indices) @ Linear.weight^T (no bias).

    indices:       (B,)   integer token ids
    emb_table:     (V, E) nn.Embedding.weight
    linear_weight: (V, E) nn.Linear(E, V, bias=False).weight
    returns:       (B, V) float32 logits
    """
    B = int(indices.shape[0])
    V, E = emb_table.shape

    # Guard the data-dependent gather DMAs against out-of-range ids.
    idx = jnp.clip(indices.astype(jnp.int32), 0, V - 1)

    # Lane-dense, 128-aligned vocab tiles; sublane-aligned batch tiles; E padded
    # to a multiple of 128 (the MXU pads K anyway, and it keeps row DMAs clean).
    E_pad = _round_up(E, 128)
    TV = min(tv, _round_up(V, 128))
    V_pad = _round_up(V, TV)
    TB = min(tb, _round_up(B, 8))
    B_pad = _round_up(B, TB)

    emb_p = jnp.zeros((V, E_pad), jnp.float32).at[:, :E].set(
        emb_table.astype(jnp.float32))
    w_p = jnp.zeros((V_pad, E_pad), param_dtype).at[:V, :E].set(
        linear_weight.astype(param_dtype))
    idx_p = jnp.zeros((B_pad,), jnp.int32).at[:B].set(idx)

    # Vocab innermost: gather happens once per batch tile, weight tiles stream
    # through the auto double-buffered pipeline and overlap with the matmul.
    grid = (B_pad // TB, V_pad // TV)

    out = pl.pallas_call(
        skipgram_kernel,
        out_shape=jax.ShapeDtypeStruct((B_pad, V_pad), jnp.float32),
        grid_spec=pltpu.PrefetchScalarGridSpec(
            num_scalar_prefetch=1,
            grid=grid,
            in_specs=[
                pl.BlockSpec(memory_space=pl.ANY),                    # emb table (HBM)
                pl.BlockSpec((TV, E_pad), lambda b, v, idx: (v, 0)),  # weight tile
            ],
            out_specs=pl.BlockSpec((TB, TV), lambda b, v, idx: (b, v)),
            scratch_shapes=[
                pltpu.VMEM((TB, E_pad), jnp.float32),    # gathered hidden rows (f32)
                pltpu.VMEM((TB, E_pad), param_dtype),    # bf16 copy for the MXU
                pltpu.SemaphoreType.DMA((TB,)),
            ],
        ),
        compiler_params=pltpu.CompilerParams(
            dimension_semantics=("parallel", "arbitrary")),
    )(idx_p, emb_p, w_p)

    return out[:B, :V]


if __name__ == "__main__":
    # Toy vocabulary from the reference script (sorted for determinism).
    sentences = ['Kage is Teacher', 'Mazong is Boss', 'Niuzong is Boss',
                 'Xiaobing is Student', 'Xiaoxue is Student']
    words = ' '.join(sentences).split()
    word_list = sorted(set(words))
    word_to_idx = {w: i for i, w in enumerate(word_list)}

    voc_size = len(word_list)        # 9
    embedding_size = 2

    # Deterministic parameter init (nn.Embedding / nn.Linear shapes).
    key = jax.random.PRNGKey(0)
    k_emb, k_lin = jax.random.split(key)
    emb_table = jax.random.normal(k_emb, (voc_size, embedding_size),
                                  dtype=jnp.float32)                  # Embedding.weight
    bound = 1.0 / (embedding_size ** 0.5)
    linear_weight = jax.random.uniform(k_lin, (voc_size, embedding_size),
                                       minval=-bound, maxval=bound,
                                       dtype=jnp.float32)             # Linear.weight

    # Small batch of target-word indices (the module's forward input X).
    X = jnp.array([word_to_idx['Kage'], word_to_idx['Boss'],
                   word_to_idx['Student'], word_to_idx['is']], dtype=jnp.int32)

    out = skipgram_forward(X, emb_table, linear_weight)
    out = jax.block_until_ready(out)

    # Reference in plain JAX with the same bf16 quantization of the operands.
    h_ref = emb_table[X].astype(jnp.bfloat16).astype(jnp.float32)
    w_ref = linear_weight.astype(jnp.bfloat16).astype(jnp.float32)
    ref = h_ref @ w_ref.T

    assert out.shape == (X.shape[0], voc_size)
    assert jnp.allclose(out, ref, atol=1e-3, rtol=1e-3), float(jnp.max(jnp.abs(out - ref)))

    print("KERNEL_OK")
</pallas_src>

<mosaic_0001>
module attributes {stable_mosaic.version = 11 : i64} {
  func.func @skipgram_kernel(%arg0: i32, %arg1: i32, %arg2: memref<8xi32, #tpu.memory_space<smem>>, %arg3: memref<9x128xf32, #tpu.memory_space<any>>, %arg4: memref<128x128xbf16, #tpu.memory_space<vmem>>, %arg5: memref<8x128xf32, #tpu.memory_space<vmem>>, %arg6: memref<8x128xf32, #tpu.memory_space<vmem>>, %arg7: memref<8x128xbf16, #tpu.memory_space<vmem>>, %arg8: memref<8x!tpu.dma_semaphore, #tpu.memory_space<semaphore_mem>>) attributes {dimension_semantics = [#tpu.dimension_semantics<parallel>, #tpu.dimension_semantics<arbitrary>], iteration_bounds = array<i64: 1, 1>, scalar_prefetch = 1 : i64, scratch_operands = 3 : i64, tpu.core_type = #tpu.core_type<tc>, window_params = [{}, {transform_indices = @transform_1, window_bounds = array<i64: 128, 128>}, {transform_indices = @transform_2, window_bounds = array<i64: 8, 128>}]} {
    %c0_i32 = arith.constant 0 : i32
    %0 = arith.cmpi eq, %arg1, %c0_i32 : i32
    %1 = arith.extui %0 : i1 to i32
    %c0_i32_0 = arith.constant 0 : i32
    %2 = arith.cmpi ne, %1, %c0_i32_0 : i32
    scf.if %2 {
      %c8_i32 = arith.constant 8 : i32
      %7 = arith.muli %arg0, %c8_i32 : i32
      %c0_i32_6 = arith.constant 0 : i32
      %c8_i32_7 = arith.constant 8 : i32
      %8 = arith.addi %c0_i32_6, %c8_i32_7 : i32
      %c1_i32 = arith.constant 1 : i32
      scf.for %arg9 = %c0_i32_6 to %8 step %c1_i32  : i32 {
        %c1_i32_17 = arith.constant 1 : i32
        %13 = arith.muli %arg9, %c1_i32_17 : i32
        %c0_i32_18 = arith.constant 0 : i32
        %14 = arith.addi %c0_i32_18, %13 : i32
        %15 = arith.addi %7, %14 : i32
        %16 = arith.index_cast %15 : i32 to index
        %17 = memref.load %arg2[%16] : memref<8xi32, #tpu.memory_space<smem>>
        %c0_i32_19 = arith.constant 0 : i32
        %18 = tpu.memref_slice %arg3[%17, %c0_i32_19] : memref<9x128xf32, #tpu.memory_space<any>> -> memref<1x128xf32, #tpu.memory_space<any>>
        %c0_i32_20 = arith.constant 0 : i32
        %19 = tpu.memref_slice %arg6[%14, %c0_i32_20] : memref<8x128xf32, #tpu.memory_space<vmem>> -> memref<1x128xf32, #tpu.memory_space<vmem>>
        %20 = tpu.memref_slice %arg8[%14] : memref<8x!tpu.dma_semaphore, #tpu.memory_space<semaphore_mem>> -> memref<1x!tpu.dma_semaphore, #tpu.memory_space<semaphore_mem>>
        %21 = tpu.memref_squeeze %20 : memref<1x!tpu.dma_semaphore, #tpu.memory_space<semaphore_mem>> -> memref<!tpu.dma_semaphore, #tpu.memory_space<semaphore_mem>>
        tpu.enqueue_dma source(%18 : memref<1x128xf32, #tpu.memory_space<any>>) target(%19 : memref<1x128xf32, #tpu.memory_space<vmem>>) target_semaphore(%21 : memref<!tpu.dma_semaphore, #tpu.memory_space<semaphore_mem>>)
      }
      %c8_i32_8 = arith.constant 8 : i32
      %c0_i32_9 = arith.constant 0 : i32
      %c8_i32_10 = arith.constant 8 : i32
      %9 = arith.addi %c0_i32_9, %c8_i32_10 : i32
      %c1_i32_11 = arith.constant 1 : i32
      scf.for %arg9 = %c0_i32_9 to %9 step %c1_i32_11  : i32 {
        %c1_i32_17 = arith.constant 1 : i32
        %13 = arith.muli %arg9, %c1_i32_17 : i32
        %c0_i32_18 = arith.constant 0 : i32
        %14 = arith.addi %c0_i32_18, %13 : i32
        %c0_i32_19 = arith.constant 0 : i32
        %c0_i32_20 = arith.constant 0 : i32
        %15 = tpu.memref_slice %arg3[%c0_i32_19, %c0_i32_20] : memref<9x128xf32, #tpu.memory_space<any>> -> memref<1x128xf32, #tpu.memory_space<any>>
        %c0_i32_21 = arith.constant 0 : i32
        %16 = tpu.memref_slice %arg6[%14, %c0_i32_21] : memref<8x128xf32, #tpu.memory_space<vmem>> -> memref<1x128xf32, #tpu.memory_space<vmem>>
        %17 = tpu.memref_slice %arg8[%14] : memref<8x!tpu.dma_semaphore, #tpu.memory_space<semaphore_mem>> -> memref<1x!tpu.dma_semaphore, #tpu.memory_space<semaphore_mem>>
        %18 = tpu.memref_squeeze %17 : memref<1x!tpu.dma_semaphore, #tpu.memory_space<semaphore_mem>> -> memref<!tpu.dma_semaphore, #tpu.memory_space<semaphore_mem>>
        tpu.wait_dma2 semaphore(%18 : memref<!tpu.dma_semaphore, #tpu.memory_space<semaphore_mem>>) src(%15 : memref<1x128xf32, #tpu.memory_space<any>>) dst(%16 : memref<1x128xf32, #tpu.memory_space<vmem>>)
      }
      %c8_i32_12 = arith.constant 8 : i32
      %c0_13 = arith.constant 0 : index
      %c0_14 = arith.constant 0 : index
      %10 = vector.load %arg6[%c0_13, %c0_14] : memref<8x128xf32, #tpu.memory_space<vmem>>, vector<8x128xf32>
      %11 = arith.truncf %10 : vector<8x128xf32> to vector<8x128xbf16>
      %c0_15 = arith.constant 0 : index
      %c0_16 = arith.constant 0 : index
      %12 = vector.load %arg7[%c0_15, %c0_16] : memref<8x128xbf16, #tpu.memory_space<vmem>>, vector<8x128xbf16>
      tpu.vector_store %arg7[%c0_15, %c0_16], %11 {strides = array<i32>} : memref<8x128xbf16, #tpu.memory_space<vmem>>, vector<8x128xbf16>,
    } else {
    }
    %c0 = arith.constant 0 : index
    %c0_1 = arith.constant 0 : index
    %3 = vector.load %arg7[%c0, %c0_1] : memref<8x128xbf16, #tpu.memory_space<vmem>>, vector<8x128xbf16>
    %c0_2 = arith.constant 0 : index
    %c0_3 = arith.constant 0 : index
    %4 = vector.load %arg4[%c0_2, %c0_3] : memref<128x128xbf16, #tpu.memory_space<vmem>>, vector<128x128xbf16>
    %cst = arith.constant dense<0.000000e+00> : vector<8x128xf32>
    %5 = tpu.matmul %3, %4, %cst {dimension_numbers = #tpu.dot_dimension_numbers<[1], [1], [0], [0], [0, 0, 1, 0], [], []>} : vector<8x128xbf16>, vector<128x128xbf16>, vector<8x128xf32> -> vector<8x128xf32>
    %c0_4 = arith.constant 0 : index
    %c0_5 = arith.constant 0 : index
    %6 = vector.load %arg5[%c0_4, %c0_5] : memref<8x128xf32, #tpu.memory_space<vmem>>, vector<8x128xf32>
    tpu.vector_store %arg5[%c0_4, %c0_5], %5 {strides = array<i32>} : memref<8x128xf32, #tpu.memory_space<vmem>>, vector<8x128xf32>,
    return
  }
  func.func @transform_1(%arg0: i32, %arg1: i32, %arg2: memref<8xi32, #tpu.memory_space<smem>>) -> (i32, i32) {
    %c0_i32 = arith.constant 0 : i32
    %c0_i32_0 = arith.constant 0 : i32
    return %arg1, %c0_i32 : i32, i32
  }
  func.func @transform_2(%arg0: i32, %arg1: i32, %arg2: memref<8xi32, #tpu.memory_space<smem>>) -> (i32, i32) {
    %c0_i32 = arith.constant 0 : i32
    return %arg0, %arg1 : i32, i32
  }
}

</mosaic_0001>

<bundles_post_ra>
// kernel: tpu_custom_call.1
= control target key start
LH: loop header
LB: loop body
LE: loop exit
PB: predicated region body
PF: predicated region fallthrough
CT: control target
= control target key end

     0   :  { %s525_s0 = inlined_call_operand.hbm [shape: s32[8], index: 0, kind: input, shape index: {}]   ;;  %s526_s1 = inlined_call_operand.hbm [shape: f32[9,128], index: 1, kind: input, shape index: {}]   ;;  %s527_s2 = inlined_call_operand.hbm [shape: bf16[128,128], index: 2, kind: input, shape index: {}]   ;;  %s528_s3 = inlined_call_operand.hbm [shape: f32[8,128], index: 3, kind: output, shape index: {}]  }
   0x1   :  { %s339_s14 = scalar_lea.hbm %s525_s0, 16 }
   0x2   :  { %p340_p0 = scmp.ne.s32.totalorder %s525_s0, %s339_s14  ;;  %p343_p1 = scmp.lt.u32.totalorder %s339_s14, %s525_s0 }
   0x4   :  { %p345_p2 = pnand %p343_p1, %p340_p0 }
   0x6   :  { %348 = shalt.err (!%p345_p2)  }
   0x7   :  { %s441_s19 = smov [#allocation6]  }
   0x8   :  { %9 = dma.hbm_to_smem %s525_s0, 16, %s441_s19, [#allocation5] }
   0x9   :  { %425 = dma.done.wait [#allocation5], 16 }
   0xa   :  { %426 = vsyncadd [#allocation5], 4294967280 }
   0xb   :  { %11 = sfence }
   0xc   :  { %12 = vsyncpa [#allocation8], 0 }
   0xd   :  { %13 = vsyncpa [#allocation9], 0  ;;  %s442_s22 = smov [#allocation7]   ;;  %s349_s26 = scalar_lea.hbm %s527_s2, 1024 }
   0xe   :  { %s19_s23 = sshll.u32 %s442_s22, 4  ;;  %p350_p3 = scmp.ne.s32.totalorder %s527_s2, %s349_s26  ;;  %s20_s23 = int_to_ptr.vmem [resolvable:$true] %s19_s23 }
   0xf   :  { %p353_p4 = scmp.lt.u32.totalorder %s349_s26, %s527_s2 }
  0x11   :  { %p355_p5 = pnand %p353_p4, %p350_p3 }
  0x13   :  { %358 = shalt.err (!%p355_p5)
}
  0x14   :  { %s359_s0 = scalar_lea.vmem %s20_s23, 1024  ;;  %p364_p7 = scmp.lt.s32.totalorder %s20_s23, %s20_s23 }
  0x15   :  { %p360_p6 = scmp.ne.s32.totalorder %s20_s23, %s359_s0  ;;  %p365_p8 = scmp.lt.s32.totalorder %s359_s0, %s359_s0 }
  0x17   :  { %p366_p9 = por %p365_p8, %p364_p7 }
  0x19   :  { %p367_p10 = pnand %p366_p9, %p360_p6 }
  0x1b   :  { %370 = shalt.err (!%p367_p10)
}
  0x1c   :  { %s443_s4 = smov 64   ;;  %s444_s5 = smov 4  }
  0x1d   :  { %25 = dma.hbm_to_vmem [thread:$0]  %s527_s2, 1024, %s20_s23, [#allocation8], %s443_s4, %s443_s4, %s444_s5  }
  0x1e   :  { %427 = dma.done.wait [#allocation8], 1024  }
  0x1f   :  { %428 = vsyncadd [#allocation8], 4294966272  ;;  %s493_s8 = smov 0  }
  0x20 LB: > { %s42_s9 = sld [smem:[#allocation6 + %s435_s8]]  ;;  %s45_s10 = scalar_lea.vmem [#allocation2], %s435_s8  ;;  %s435_s8 = sphi %s493_s8, %s40_s8  }
  0x21   : > { %s54_s11 = sshll.u32 %s45_s10, 4  ;;  %s46_s15 = scalar_lea.sflag [#allocation4], %s435_s8  ;;  %s55_s11 = int_to_ptr.vmem [resolvable:$true] %s54_s11 }
  0x22   : > { %s373_s19 = scalar_lea.hbm %s526_s1, 256 }
  0x26   : > { %s262_s12 = sshll.u32 %s42_s9, 4 }
  0x27   : > { %s44_s2 = scalar_lea.hbm %s526_s1, %s262_s12 }
  0x28   : > { %s371_s16 = scalar_lea.hbm %s44_s2, 16  ;;  %p374_p12 = scmp.lt.u32.totalorder %s44_s2, %s526_s1 }
  0x29   : > { %p372_p11 = scmp.ne.s32.totalorder %s44_s2, %s371_s16  ;;  %p375_p13 = scmp.lt.u32.totalorder %s373_s19, %s371_s16 }
  0x2a   : > { %p377_p1 = scmp.lt.u32.totalorder %s371_s16, %s44_s2 }
  0x2b   : > { %p376_p0 = por %p375_p13, %p374_p12 }
  0x2d   : > { %p378_p2 = por %p377_p1, %p376_p0 }
  0x2f   : > { %p379_p3 = pnand %p378_p2, %p372_p11 }
  0x31   : > { %382 = shalt.err (!%p379_p3)  }
  0x32   : > { %s383_s22 = scalar_lea.vmem %s55_s11, 16  ;;  %s445_s23 = smov [#allocation2]  }
  0x33   : > { %p384_p4 = scmp.ne.s32.totalorder %s55_s11, %s383_s22  ;;  %s385_s24 = sshll.u32 %s445_s23, 4  ;;  %s386_s24 = int_to_ptr.vmem [resolvable:$false] %s385_s24 }
  0x34   : > { %s387_s25 = scalar_lea.vmem %s386_s24, 128  ;;  %p388_p5 = scmp.lt.s32.totalorder %s55_s11, %s386_s24 }
  0x35   : > { %p389_p6 = scmp.lt.s32.totalorder %s387_s25, %s383_s22 }
  0x37   : > { %p390_p7 = por %p389_p6, %p388_p5 }
  0x39   : > { %p391_p8 = pnand %p390_p7, %p384_p4 }
  0x3b   : > { %394 = shalt.err (!%p391_p8)  }
  0x3c   : > { %57 = dma.hbm_to_vmem [thread:$0]  %s44_s2, 16, %s55_s11, %s46_s15 }
  0x3d   : > { %s40_s8 = sadd.s32 1, %s435_s8  }
  0x3e   : > { %p37_p9 = scmp.ge.s32.totalorder %s40_s8, 8  }
  0x3f   :  { %s437_s26 = smov (%p37_p9), 0  }
  0x40   :  { %39 = sbr.rel (!%p37_p9) target bundleno = 32 (0x20), region = 61 }
  0x47 LB: > { %s64_s27 = scalar_lea.sflag [#allocation4], %s439_s26  ;;  %s439_s26 = sphi %s437_s26, %s63_s26  }
  0x48   : > { %429 = dma.done.wait %s64_s27, 16 }
  0x49   : > { %430 = vsyncadd %s64_s27, 4294967280  ;;  %s63_s26 = sadd.s32 1, %s439_s26  }
  0x4a   : > { %p60_p10 = scmp.ge.s32.totalorder %s63_s26, 8  }
  0x4b   :  { %v331_v0 = vld [vmem:[#allocation7] sm:$0xff] (%p60_p10)   ;;  %v446_v1 = vmov (%p60_p10), 0.0   ;;  %vm447_vm0 = vmmov (%p60_p10), 0   ;;  %v332_v2 = vld [vmem:[#allocation7 + $0x8] sm:$0xff] (%p60_p10)   ;;  %v68_v3 = vld [vmem:[#allocation2] sm:$0xff] (%p60_p10)  ;;  %s448_s1 = smov (%p60_p10), [#allocation10]  }
  0x4c   :  { %62 = sbr.rel (!%p60_p10) target bundleno = 71 (0x47), region = 72  ;;  %288 = vmatprep.subr.bf16.mxu0 (%p60_p10), %v446_v1  ;;  %304 = vmatprep.mubr.msk.bf16.mxu0 (%p60_p10), %vm447_vm0, %v446_v1  ;;  %v69_v4 = vpack.c.bf16 (%p60_p10), %v68_v3, %v68_v3  ;;  %v333_v5 = vld [vmem:[#allocation7 + $0x10] sm:$0xff] (%p60_p10)   ;;  %v334_v6 = vld [vmem:[#allocation7 + $0x18] sm:$0xff] (%p60_p10)   ;;  %v335_v7 = vld [vmem:[#allocation7 + $0x20] sm:$0xff] (%p60_p10)   ;;  %s183_s28 = sshll.u32 (%p60_p10), %s448_s1, 4  ;;  %s184_s28 = int_to_ptr.vmem [resolvable:$true] %s183_s28 }
  0x4d   :  { %289 = vmatpush3.bf16.xpose.msra.mxu0 (%p60_p10), %v331_v0  ;;  %v336_v8 = vld [vmem:[#allocation7 + $0x28] sm:$0xff] (%p60_p10)   ;;  %v337_v9 = vld [vmem:[#allocation7 + $0x30] sm:$0xff] (%p60_p10)   ;;  %v338_v10 = vld [vmem:[#allocation7 + $0x38] sm:$0xff] (%p60_p10)   ;;  %s395_s29 = scalar_lea.vmem (%p60_p10), %s184_s28, 128  ;;  %p400_p12 = scmp.lt.s32.totalorder (%p60_p10), %s184_s28, %s184_s28 }
  0x4e   :  { %290 = vmatprep.subr.bf16.mxu0 (%p60_p10), %v446_v1  ;;  %70 = vst [vmem:[#allocation3] sm:$0xf] (%p60_p10), %v69_v4  ;;  %p396_p11 = scmp.ne.s32.totalorder (%p60_p10), %s184_s28, %s395_s29  ;;  %p401_p13 = scmp.lt.s32.totalorder (%p60_p10), %s395_s29, %s395_s29 }
  0x50   :  { %p402_p0 = por (%p60_p10), %p401_p13, %p400_p12 }
  0x52   :  { %p403_p1 = pnand (%p60_p10), %p402_p0, %p396_p11 }
  0x55   :  { %291 = vmatpush3.bf16.xpose.msra.mxu0 %v332_v2  ;;  %v71_v11 = vld [vmem:[#allocation3] sm:$0xf] }
  0x56   :  { %292 = vmatprep.subr.bf16.mxu0 %v446_v1 }
  0x5d   :  { %293 = vmatpush3.bf16.xpose.msra.mxu0 %v333_v5 }
  0x5e   :  { %294 = vmatprep.subr.bf16.mxu0 %v446_v1 }
  0x65   :  { %295 = vmatpush3.bf16.xpose.msra.mxu0 %v334_v6 }
  0x66   :  { %296 = vmatprep.subr.bf16.mxu0 %v446_v1 }
  0x6d   :  { %297 = vmatpush3.bf16.xpose.msra.mxu0 %v335_v7 }
  0x6e   :  { %298 = vmatprep.subr.bf16.mxu0 %v446_v1 }
  0x75   :  { %299 = vmatpush3.bf16.xpose.msra.mxu0 %v336_v8 }
  0x76   :  { %300 = vmatprep.subr.bf16.mxu0 %v446_v1 }
  0x7d   :  { %301 = vmatpush3.bf16.xpose.msra.mxu0 %v337_v9 }
  0x7e   :  { %302 = vmatprep.subr.bf16.mxu0 %v446_v1 }
  0x85   :  { %303 = vmatpush3.bf16.xpose.msra.mxu0 %v338_v10 }
  0x8c   :  { %305 = vmatmul.mubr.bf16.vlgmr.msra.gmra.mrb[0].mxu0 %v71_v11 }
 0x15f   :  { %v170_v12 = vpop.f32.mrb[0].mxu0 }
 0x160   :  { %176 = vst [vmem:[#allocation10] sm:$0xff] %v170_v12  ;;  %v306_v13 = vpop.f32.mrb[1].mxu0 }
 0x161   :  { %v173_v14 = vpop.f32.mrb[2].mxu0 }
 0x162   :  { %406 = shalt.err (!%p403_p1)
}
 0x163   :  { %s407_s4 = scalar_lea.hbm %s528_s3, 128 }
 0x164   :  { %p408_p2 = scmp.ne.s32.totalorder %s528_s3, %s407_s4  ;;  %p411_p3 = scmp.lt.u32.totalorder %s407_s4, %s528_s3 }
 0x166   :  { %p413_p4 = pnand %p411_p3, %p408_p2 }
 0x168   :  { %416 = shalt.err (!%p413_p4)
}
 0x169   :  { %186 = dma.vmem_to_hbm [thread:$0]  %s184_s28, 128, %s528_s3, [#allocation9]   ;;  %v307_v15 = vpop.f32.mrb[3].mxu0 }
 0x16a   :  { %431 = dma.done.wait [#allocation9], 128  }
 0x16b   :  { %432 = vsyncadd [#allocation9], 4294967168 }
 0x16c   :  { %190 = vsyncpa [#allocation8], 1 }
 0x16d   :  { %191 = vsyncpa [#allocation9], 1 }
 0x16e   :  { %192 = vsyncmov [#allocation4] }
 0x171   :  { %s193_s11 = vpop.sfrf %192 }
 0x172   :  { %p271_p5 = scmp.ne.s32.totalorder %s193_s11, 0 }
 0x174   :  { %197 = shalt.err (%p271_p5)  }
 0x175   :  { %199 = vsyncmov [#allocation4 + $0x1] }
 0x178   :  { %s200_s12 = vpop.sfrf %199 }
 0x179   :  { %p272_p6 = scmp.ne.s32.totalorder %s200_s12, 0 }
 0x17b   :  { %204 = shalt.err (%p272_p6)  }
 0x17c   :  { %206 = vsyncmov [#allocation4 + $0x2] }
 0x17f   :  { %s207_s13 = vpop.sfrf %206 }
 0x180   :  { %p273_p7 = scmp.ne.s32.totalorder %s207_s13, 0 }
 0x182   :  { %211 = shalt.err (%p273_p7)  }
 0x183   :  { %213 = vsyncmov [#allocation4 + $0x3] }
 0x186   :  { %s214_s14 = vpop.sfrf %213 }
 0x187   :  { %p274_p8 = scmp.ne.s32.totalorder %s214_s14, 0 }
 0x189   :  { %218 = shalt.err (%p274_p8)  }
 0x18a   :  { %220 = vsyncmov [#allocation4 + $0x4] }
 0x18d   :  { %s221_s3 = vpop.sfrf %220 }
 0x18e   :  { %p275_p9 = scmp.ne.s32.totalorder %s221_s3, 0 }
 0x190   :  { %225 = shalt.err (%p275_p9)  }
 0x191   :  { %227 = vsyncmov [#allocation4 + $0x5] }
 0x194   :  { %s228_s2 = vpop.sfrf %227 }
 0x195   :  { %p276_p10 = scmp.ne.s32.totalorder %s228_s2, 0 }
 0x197   :  { %232 = shalt.err (%p276_p10)  }
 0x198   :  { %234 = vsyncmov [#allocation4 + $0x6] }
 0x19b   :  { %s235_s15 = vpop.sfrf %234 }
 0x19c   :  { %p277_p11 = scmp.ne.s32.totalorder %s235_s15, 0 }
 0x19e   :  { %239 = shalt.err (%p277_p11)  }
 0x19f   :  { %241 = vsyncmov [#allocation4 + $0x7] }
 0x1a2   :  { %s242_s16 = vpop.sfrf %241 }
 0x1a3   :  { %p278_p12 = scmp.ne.s32.totalorder %s242_s16, 0 }
 0x1a5   :  { %246 = shalt.err (%p278_p12)  }

</bundles_post_ra>
